<compile_context>
chip_gen: v6e
topology: v6e:2x2x1
jax: 0.10.0
libtpu: 0.0.40
codegen_flags: <defaults>
</compile_context>

<pallas_src>
import functools

import jax
import jax.numpy as jnp
from jax.experimental import pallas as pl
from jax.experimental.pallas import tpu as pltpu


def feature_extractor_kernel(x_ref, w1_ref, b1_ref, w2_ref, b2_ref,
                             g_ref, beta_ref, o_ref, *, use_bf16_mxu):
    x = x_ref[...]                       # (TB, D_in)  f32
    w1 = w1_ref[...]                     # (D_in, D_out)
    w2 = w2_ref[...]                     # (D_out, D_out)

    if use_bf16_mxu:
        x = x.astype(jnp.bfloat16)
        w1 = w1.astype(jnp.bfloat16)
        w2 = w2.astype(jnp.bfloat16)

    # ---- First linear (+ relu) on the MXU; K=D_in is tiny but the MXU is
    # otherwise idle here, and this keeps the XLU free for the LN reductions.
    h = jnp.dot(x, w1, preferred_element_type=jnp.float32) + b1_ref[...]
    h = jnp.maximum(h, 0.0)

    # ---- Second linear (+ relu) on the MXU, f32 accumulate.
    h_mm = h.astype(jnp.bfloat16) if use_bf16_mxu else h
    h1 = jnp.dot(h_mm, w2, preferred_element_type=jnp.float32) + b2_ref[...]
    h1 = jnp.maximum(h1, 0.0)

    # ---- Residual add + LayerNorm over the feature (lane) axis.
    # Two-pass variance: matches nn.LayerNorm numerics (no E[y^2]-mu^2 drift).
    y = h1 + h
    mean = jnp.mean(y, axis=-1, keepdims=True)
    centered = y - mean
    var = jnp.mean(centered * centered, axis=-1, keepdims=True)
    normed = centered * jax.lax.rsqrt(var + 1e-5)
    o_ref[...] = (normed * g_ref[...] + beta_ref[...]).astype(o_ref.dtype)


def _pick_tile_b(batch: int, cap: int = 2048) -> int:
    """Largest multiple-of-8 tile <= cap that covers the batch.

    cap=2048 keeps per-step VMEM at ~2.3 MB (well under every generation's
    scoped limit) while amortizing the ~0.35 us fixed per-grid-step cost and
    keeping writeback near the HBM roofline. The wrapper pads B up to a
    multiple of the returned tile, so tile_b never has to divide B exactly.
    """
    padded = ((batch + 7) // 8) * 8      # round batch up to a multiple of 8
    return min(cap, padded)


def feature_extractor_layer(x, w1, b1, w2, b2, gamma, beta, *,
                            tile_b=None, out_dtype=None, use_bf16_mxu=False):
    """x: (B, D_in) -> (B, D_out).  f32 semantics by default."""
    B, d_in = x.shape
    d_out = w1.shape[1]
    if out_dtype is None:
        out_dtype = x.dtype
    if tile_b is None:
        tile_b = _pick_tile_b(B)
    assert tile_b % 8 == 0, tile_b

    # Pad batch to a multiple of tile_b (zero rows are harmless: relu/LN of a
    # zero row is finite) and slice the result back afterwards.
    b_pad = ((B + tile_b - 1) // tile_b) * tile_b
    if b_pad != B:
        x_in = jnp.zeros((b_pad, d_in), dtype=x.dtype).at[:B].set(x)
    else:
        x_in = x

    # 2-D (1, F) views so biases / LN params tile cleanly and broadcast rows.
    b1_2d = b1.reshape(1, d_out)
    b2_2d = b2.reshape(1, d_out)
    g_2d = gamma.reshape(1, d_out)
    beta_2d = beta.reshape(1, d_out)

    grid = (b_pad // tile_b,)
    kernel = functools.partial(feature_extractor_kernel,
                               use_bf16_mxu=use_bf16_mxu)

    out = pl.pallas_call(
        kernel,
        out_shape=jax.ShapeDtypeStruct((b_pad, d_out), out_dtype),
        grid_spec=pltpu.PrefetchScalarGridSpec(
            num_scalar_prefetch=0,
            grid=grid,
            in_specs=[
                # x: tiled over batch; d_in (=7) equals the full array dim so
                # the 128-lane divisibility rule does not apply to it.
                pl.BlockSpec((tile_b, d_in), lambda i: (i, 0)),
                # Constants: index map never changes -> DMA'd once, resident.
                pl.BlockSpec((d_in, d_out), lambda i: (0, 0)),
                pl.BlockSpec((1, d_out), lambda i: (0, 0)),
                pl.BlockSpec((d_out, d_out), lambda i: (0, 0)),
                pl.BlockSpec((1, d_out), lambda i: (0, 0)),
                pl.BlockSpec((1, d_out), lambda i: (0, 0)),
                pl.BlockSpec((1, d_out), lambda i: (0, 0)),
            ],
            out_specs=pl.BlockSpec((tile_b, d_out), lambda i: (i, 0)),
        ),
        compiler_params=pltpu.CompilerParams(
            dimension_semantics=(pltpu.PARALLEL,)),
    )(x_in, w1, b1_2d, w2, b2_2d, g_2d, beta_2d)

    return out[:B] if b_pad != B else out


def reference_forward(x, w1, b1, w2, b2, gamma, beta):
    h = jnp.maximum(x @ w1 + b1, 0.0)
    h1 = jnp.maximum(h @ w2 + b2, 0.0)
    y = h1 + h
    mean = jnp.mean(y, axis=-1, keepdims=True)
    var = jnp.mean((y - mean) ** 2, axis=-1, keepdims=True)
    return (y - mean) * jax.lax.rsqrt(var + 1e-5) * gamma + beta


if __name__ == "__main__":
    input_size = 7
    output_size = 128
    batch = 100  # not a multiple of 8 -> exercises the pad/slice path

    key = jax.random.PRNGKey(0)
    kx, kw1, kw2 = jax.random.split(key, 3)

    # Parameters mirroring the module's __init__: normal_ weights, zero
    # biases, LayerNorm gamma=1 / beta=0.
    x = jax.random.normal(kx, (batch, input_size), dtype=jnp.float32)
    w1 = jax.random.normal(kw1, (input_size, output_size), dtype=jnp.float32)
    b1 = jnp.zeros((output_size,), dtype=jnp.float32)
    w2 = jax.random.normal(kw2, (output_size, output_size), dtype=jnp.float32)
    b2 = jnp.zeros((output_size,), dtype=jnp.float32)
    gamma = jnp.ones((output_size,), dtype=jnp.float32)
    beta = jnp.zeros((output_size,), dtype=jnp.float32)

    out = feature_extractor_layer(x, w1, b1, w2, b2, gamma, beta)
    out = jax.block_until_ready(out)

    ref = reference_forward(x, w1, b1, w2, b2, gamma, beta)
    assert out.shape == (batch, output_size)
    assert jnp.allclose(out, ref, atol=2e-3, rtol=2e-3), "mismatch vs reference"

    print("KERNEL_OK")
</pallas_src>

<mosaic_0001>
module attributes {stable_mosaic.version = 11 : i64} {
  func.func @feature_extractor_kernel(%arg0: i32, %arg1: memref<104x7xf32, #tpu.memory_space<vmem>>, %arg2: memref<7x128xf32, #tpu.memory_space<vmem>>, %arg3: memref<1x128xf32, #tpu.memory_space<vmem>>, %arg4: memref<128x128xf32, #tpu.memory_space<vmem>>, %arg5: memref<1x128xf32, #tpu.memory_space<vmem>>, %arg6: memref<1x128xf32, #tpu.memory_space<vmem>>, %arg7: memref<1x128xf32, #tpu.memory_space<vmem>>, %arg8: memref<104x128xf32, #tpu.memory_space<vmem>>) attributes {dimension_semantics = [#tpu.dimension_semantics<parallel>], iteration_bounds = array<i64: 1>, scalar_prefetch = 0 : i64, scratch_operands = 0 : i64, tpu.core_type = #tpu.core_type<tc>, window_params = [{transform_indices = @transform_0, window_bounds = array<i64: 104, 7>}, {pipeline_mode = #tpu.pipeline_mode<synchronous>, transform_indices = @transform_1, window_bounds = array<i64: 7, 128>}, {pipeline_mode = #tpu.pipeline_mode<synchronous>, transform_indices = @transform_2, window_bounds = array<i64: 1, 128>}, {pipeline_mode = #tpu.pipeline_mode<synchronous>, transform_indices = @transform_3, window_bounds = array<i64: 128, 128>}, {pipeline_mode = #tpu.pipeline_mode<synchronous>, transform_indices = @transform_4, window_bounds = array<i64: 1, 128>}, {pipeline_mode = #tpu.pipeline_mode<synchronous>, transform_indices = @transform_5, window_bounds = array<i64: 1, 128>}, {pipeline_mode = #tpu.pipeline_mode<synchronous>, transform_indices = @transform_6, window_bounds = array<i64: 1, 128>}, {transform_indices = @transform_7, window_bounds = array<i64: 104, 128>}]} {
    %c0 = arith.constant 0 : index
    %c0_0 = arith.constant 0 : index
    %0 = vector.load %arg1[%c0, %c0_0] : memref<104x7xf32, #tpu.memory_space<vmem>>, vector<104x7xf32>
    %c0_1 = arith.constant 0 : index
    %c0_2 = arith.constant 0 : index
    %1 = vector.load %arg2[%c0_1, %c0_2] : memref<7x128xf32, #tpu.memory_space<vmem>>, vector<7x128xf32>
    %c0_3 = arith.constant 0 : index
    %c0_4 = arith.constant 0 : index
    %2 = vector.load %arg4[%c0_3, %c0_4] : memref<128x128xf32, #tpu.memory_space<vmem>>, vector<128x128xf32>
    %cst = arith.constant dense<0.000000e+00> : vector<104x128xf32>
    %3 = tpu.matmul %0, %1, %cst {dimension_numbers = #tpu.dot_dimension_numbers<[1], [0], [0], [1], [0, 0, 1, 1], [], []>} : vector<104x7xf32>, vector<7x128xf32>, vector<104x128xf32> -> vector<104x128xf32>
    %c0_5 = arith.constant 0 : index
    %c0_6 = arith.constant 0 : index
    %4 = vector.load %arg3[%c0_5, %c0_6] : memref<1x128xf32, #tpu.memory_space<vmem>>, vector<1x128xf32>
    %5 = vector.broadcast %4 : vector<1x128xf32> to vector<104x128xf32>
    %6 = arith.addf %3, %5 : vector<104x128xf32>
    %cst_7 = arith.constant 0.000000e+00 : f32
    %7 = vector.broadcast %cst_7 : f32 to vector<104x128xf32>
    %8 = arith.maximumf %6, %7 : vector<104x128xf32>
    %cst_8 = arith.constant dense<0.000000e+00> : vector<104x128xf32>
    %9 = tpu.matmul %8, %2, %cst_8 {dimension_numbers = #tpu.dot_dimension_numbers<[1], [0], [0], [1], [0, 0, 1, 1], [], []>} : vector<104x128xf32>, vector<128x128xf32>, vector<104x128xf32> -> vector<104x128xf32>
    %c0_9 = arith.constant 0 : index
    %c0_10 = arith.constant 0 : index
    %10 = vector.load %arg5[%c0_9, %c0_10] : memref<1x128xf32, #tpu.memory_space<vmem>>, vector<1x128xf32>
    %11 = vector.broadcast %10 : vector<1x128xf32> to vector<104x128xf32>
    %12 = arith.addf %9, %11 : vector<104x128xf32>
    %cst_11 = arith.constant 0.000000e+00 : f32
    %13 = vector.broadcast %cst_11 : f32 to vector<104x128xf32>
    %14 = arith.maximumf %12, %13 : vector<104x128xf32>
    %15 = arith.addf %14, %8 : vector<104x128xf32>
    %cst_12 = arith.constant dense<0.000000e+00> : vector<104xf32>
    %16 = vector.multi_reduction <add>, %15, %cst_12 [1] : vector<104x128xf32> to vector<104xf32>
    %17 = vector.shape_cast %16 : vector<104xf32> to vector<104x1xf32>
    %cst_13 = arith.constant 1.280000e+02 : f32
    %18 = vector.broadcast %cst_13 : f32 to vector<104x1xf32>
    %19 = arith.divf %17, %18 : vector<104x1xf32>
    %20 = vector.broadcast %19 : vector<104x1xf32> to vector<104x128xf32>
    %21 = arith.subf %15, %20 : vector<104x128xf32>
    %22 = arith.mulf %21, %21 : vector<104x128xf32>
    %cst_14 = arith.constant dense<0.000000e+00> : vector<104xf32>
    %23 = vector.multi_reduction <add>, %22, %cst_14 [1] : vector<104x128xf32> to vector<104xf32>
    %24 = vector.shape_cast %23 : vector<104xf32> to vector<104x1xf32>
    %cst_15 = arith.constant 1.280000e+02 : f32
    %25 = vector.broadcast %cst_15 : f32 to vector<104x1xf32>
    %26 = arith.divf %24, %25 : vector<104x1xf32>
    %cst_16 = arith.constant 9.99999974E-6 : f32
    %27 = vector.broadcast %cst_16 : f32 to vector<104x1xf32>
    %28 = arith.addf %26, %27 : vector<104x1xf32>
    %29 = math.rsqrt %28 : vector<104x1xf32>
    %30 = vector.broadcast %29 : vector<104x1xf32> to vector<104x128xf32>
    %31 = arith.mulf %21, %30 : vector<104x128xf32>
    %c0_17 = arith.constant 0 : index
    %c0_18 = arith.constant 0 : index
    %32 = vector.load %arg6[%c0_17, %c0_18] : memref<1x128xf32, #tpu.memory_space<vmem>>, vector<1x128xf32>
    %33 = vector.broadcast %32 : vector<1x128xf32> to vector<104x128xf32>
    %34 = arith.mulf %31, %33 : vector<104x128xf32>
    %c0_19 = arith.constant 0 : index
    %c0_20 = arith.constant 0 : index
    %35 = vector.load %arg7[%c0_19, %c0_20] : memref<1x128xf32, #tpu.memory_space<vmem>>, vector<1x128xf32>
    %36 = vector.broadcast %35 : vector<1x128xf32> to vector<104x128xf32>
    %37 = arith.addf %34, %36 : vector<104x128xf32>
    %c0_21 = arith.constant 0 : index
    %c0_22 = arith.constant 0 : index
    %38 = vector.load %arg8[%c0_21, %c0_22] : memref<104x128xf32, #tpu.memory_space<vmem>>, vector<104x128xf32>
    tpu.vector_store %arg8[%c0_21, %c0_22], %37 {strides = array<i32>} : memref<104x128xf32, #tpu.memory_space<vmem>>, vector<104x128xf32>,
    return
  }
  func.func @transform_0(%arg0: i32) -> (i32, i32) {
    %c0_i32 = arith.constant 0 : i32
    %c0_i32_0 = arith.constant 0 : i32
    return %arg0, %c0_i32 : i32, i32
  }
  func.func @transform_1(%arg0: i32) -> (i32, i32) {
    %c0_i32 = arith.constant 0 : i32
    %c0_i32_0 = arith.constant 0 : i32
    %c0_i32_1 = arith.constant 0 : i32
    return %c0_i32, %c0_i32_0 : i32, i32
  }
  func.func @transform_2(%arg0: i32) -> (i32, i32) {
    %c0_i32 = arith.constant 0 : i32
    %c0_i32_0 = arith.constant 0 : i32
    %c0_i32_1 = arith.constant 0 : i32
    return %c0_i32, %c0_i32_0 : i32, i32
  }
  func.func @transform_3(%arg0: i32) -> (i32, i32) {
    %c0_i32 = arith.constant 0 : i32
    %c0_i32_0 = arith.constant 0 : i32
    %c0_i32_1 = arith.constant 0 : i32
    return %c0_i32, %c0_i32_0 : i32, i32
  }
  func.func @transform_4(%arg0: i32) -> (i32, i32) {
    %c0_i32 = arith.constant 0 : i32
    %c0_i32_0 = arith.constant 0 : i32
    %c0_i32_1 = arith.constant 0 : i32
    return %c0_i32, %c0_i32_0 : i32, i32
  }
  func.func @transform_5(%arg0: i32) -> (i32, i32) {
    %c0_i32 = arith.constant 0 : i32
    %c0_i32_0 = arith.constant 0 : i32
    %c0_i32_1 = arith.constant 0 : i32
    return %c0_i32, %c0_i32_0 : i32, i32
  }
  func.func @transform_6(%arg0: i32) -> (i32, i32) {
    %c0_i32 = arith.constant 0 : i32
    %c0_i32_0 = arith.constant 0 : i32
    %c0_i32_1 = arith.constant 0 : i32
    return %c0_i32, %c0_i32_0 : i32, i32
  }
  func.func @transform_7(%arg0: i32) -> (i32, i32) {
    %c0_i32 = arith.constant 0 : i32
    %c0_i32_0 = arith.constant 0 : i32
    return %arg0, %c0_i32 : i32, i32
  }
}

</mosaic_0001>

<bundles_post_ra>
// kernel: tpu_custom_call.1
= control target key start
LH: loop header
LB: loop body
LE: loop exit
PB: predicated region body
PF: predicated region fallthrough
CT: control target
= control target key end

     0   :  { %12 = vsyncpa [#allocation3], 0  ;;  %s1397_s0 = inlined_call_operand.vmem [shape: f32[104,7], index: 0, kind: input, shape index: {}]   ;;  %s1398_s1 = inlined_call_operand.vmem [shape: f32[7,128], index: 1, kind: input, shape index: {}]   ;;  %s1399_s2 = inlined_call_operand.vmem [shape: f32[1,128], index: 2, kind: input, shape index: {}]   ;;  %s1400_s3 = inlined_call_operand.hbm [shape: f32[128,128], index: 3, kind: input, shape index: {}]   ;;  %s1401_s4 = inlined_call_operand.vmem [shape: f32[1,128], index: 4, kind: input, shape index: {}]   ;;  %s1402_s5 = inlined_call_operand.vmem [shape: f32[1,128], index: 5, kind: input, shape index: {}]   ;;  %s1403_s6 = inlined_call_operand.vmem [shape: f32[1,128], index: 6, kind: input, shape index: {}]   ;;  %s1404_s7 = inlined_call_operand.hbm [shape: f32[104,128], index: 7, kind: output, shape index: {}]  }
   0x1   :  { %13 = vsyncpa [#allocation4], 0  ;;  %s923_s24 = smov [#allocation2]  }
   0x2   :  { %s25_s25 = sshll.u32 %s923_s24, 4  ;;  %s26_s25 = int_to_ptr.vmem [resolvable:$true] %s25_s25 }
   0x3   :  { %s887_s26 = scalar_lea.vmem %s26_s25, 2048  ;;  %p892_p1 = scmp.lt.s32.totalorder %s26_s25, %s26_s25 }
   0x4   :  { %p888_p0 = scmp.ne.s32.totalorder %s26_s25, %s887_s26  ;;  %p893_p2 = scmp.lt.s32.totalorder %s887_s26, %s887_s26 }
   0x6   :  { %p894_p3 = por %p893_p2, %p892_p1 }
   0x8   :  { %p895_p4 = pnand %p894_p3, %p888_p0 }
   0xa   :  { %898 = shalt.err (!%p895_p4)
}
   0xb   :  { %s924_s27 = smov 128   ;;  %s925_s28 = smov 8  }
   0xc   :  { %31 = dma.hbm_to_vmem [thread:$0]  %s1400_s3, 2048, %s26_s25, [#allocation3], %s924_s27, %s924_s27, %s925_s28  }
   0xd   :  { %919 = dma.done.wait [#allocation3], 2048  }
   0xe   :  { %920 = vsyncadd [#allocation3], 4294965248  ;;  %v926_v0 = vmov 0.0   ;;  %vm927_vm0 = vmmov 0   ;;  %vm118_vm1 = vcmask 1046528   ;;  %vm78_vm2 = vcmask 56320  }
   0xf   :  { %703 = vmatprep.subr.mxu0 %v926_v0  ;;  %705 = vmatprep.mubr.msk.f32.mxu0 %vm927_vm0, %v926_v0  ;;  %v54_v1 = vld [vmem:[%s1398_s1] sm:$0x7f]  ;;  %v42_v3 = vld [vmem:[%s1397_s0 + $0x8] sm:$0xff]  ;;  %v70_v4 = vld [vmem:[#allocation2 + $0x78] sm:$0xff] }
  0x10   :  { %815 = vmatprep.subr.mxu1 %v926_v0  ;;  %785 = vmatprep.mubr.msk.f32.mxu1 %vm927_vm0, %v926_v0  ;;  %v41_v2 = vld [vmem:[%s1397_s0] sm:$0xff]  ;;  %v69_v5 = vld [vmem:[#allocation2 + $0x70] sm:$0xff]  ;;  %v68_v6 = vld [vmem:[#allocation2 + $0x68] sm:$0xff] }
  0x11   :  { %704 = vmatpush3.msk.msra.mxu0 %vm118_vm1, %v54_v1  ;;  %831 = vmatpush3.msra.mxu1 %v70_v4  ;;  %v43_v7 = vld [vmem:[%s1397_s0 + $0x10] sm:$0xff]  ;;  %v67_v8 = vld [vmem:[#allocation2 + $0x60] sm:$0xff]  ;;  %v66_v9 = vld [vmem:[#allocation2 + $0x58] sm:$0xff] }
  0x12   :  { %706 = vmatmul.mubr.msk.f32.vlgmr.msra.gmra.mxu0 %vm78_vm2, %v41_v2  ;;  %744 = vmatprep.subr.mxu0 %v926_v0  ;;  %v44_v10 = vld [vmem:[%s1397_s0 + $0x18] sm:$0xff]  ;;  %v65_v11 = vld [vmem:[#allocation2 + $0x50] sm:$0xff]  ;;  %v64_v12 = vld [vmem:[#allocation2 + $0x48] sm:$0xff] }
  0x13   :  { %708 = vmatprep.mubr.msk.f32.mxu0 %vm927_vm0, %v926_v0  ;;  %745 = vmatpush3.msra.mxu0 %v70_v4  ;;  %v45_v13 = vld [vmem:[%s1397_s0 + $0x20] sm:$0xff]  ;;  %v62_v15 = vld [vmem:[#allocation2 + $0x38] sm:$0xff]  ;;  %v46_v16 = vld [vmem:[%s1397_s0 + $0x28] sm:$0xff] }
  0x14   :  { %746 = vmatprep.subr.mxu0 %v926_v0  ;;  %816 = vmatprep.subr.mxu1 %v926_v0  ;;  %v63_v14 = vld [vmem:[#allocation2 + $0x40] sm:$0xff]  ;;  %v61_v17 = vld [vmem:[#allocation2 + $0x30] sm:$0xff]  ;;  %v60_v18 = vld [vmem:[#allocation2 + $0x28] sm:$0xff] }
  0x15   :  { %747 = vmatpush3.msra.mxu0 %v69_v5  ;;  %832 = vmatpush3.msra.mxu1 %v69_v5  ;;  %v47_v19 = vld [vmem:[%s1397_s0 + $0x30] sm:$0xff]  ;;  %v59_v20 = vld [vmem:[#allocation2 + $0x20] sm:$0xff]  ;;  %v58_v21 = vld [vmem:[#allocation2 + $0x18] sm:$0xff] }
  0x16   :  { %709 = vmatmul.mubr.msk.f32.gmra.mxu0 %vm78_vm2, %v42_v3  ;;  %748 = vmatprep.subr.mxu0 %v926_v0  ;;  %v48_v22 = vld [vmem:[%s1397_s0 + $0x38] sm:$0xff]  ;;  %v49_v23 = vld [vmem:[%s1397_s0 + $0x40] sm:$0xff]  ;;  %v50_v24 = vld [vmem:[%s1397_s0 + $0x48] sm:$0xff] }
  0x17   :  { %711 = vmatprep.mubr.msk.f32.mxu0 %vm927_vm0, %v926_v0  ;;  %749 = vmatpush3.msra.mxu0 %v68_v6  ;;  %v51_v25 = vld [vmem:[%s1397_s0 + $0x50] sm:$0xff]  ;;  %v52_v26 = vld [vmem:[%s1397_s0 + $0x58] sm:$0xff]  ;;  %v53_v27 = vld [vmem:[%s1397_s0 + $0x60] sm:$0xff] }
  0x18   :  { %750 = vmatprep.subr.mxu0 %v926_v0  ;;  %817 = vmatprep.subr.mxu1 %v926_v0  ;;  %v57_v28 = vld [vmem:[#allocation2 + $0x10] sm:$0xff]  ;;  %v56_v29 = vld [vmem:[#allocation2 + $0x8] sm:$0xff]  ;;  %v55_v30 = vld [vmem:[#allocation2] sm:$0xff] }
  0x19   :  { %751 = vmatpush3.msra.mxu0 %v67_v8  ;;  %833 = vmatpush3.msra.mxu1 %v68_v6  ;;  %v1096_v31 = vld [vmem:[%s1399_s2] ss:$0 sm:$0xff] }
  0x1a   :  { %712 = vmatmul.mubr.msk.f32.gmra.mxu0 %vm78_vm2, %v43_v7  ;;  %752 = vmatprep.subr.mxu0 %v926_v0 }
  0x1b   :  { %714 = vmatprep.mubr.msk.f32.mxu0 %vm927_vm0, %v926_v0  ;;  %753 = vmatpush3.msra.mxu0 %v66_v9 }
  0x1c   :  { %754 = vmatprep.subr.mxu0 %v926_v0  ;;  %818 = vmatprep.subr.mxu1 %v926_v0 }
  0x1d   :  { %755 = vmatpush3.msra.mxu0 %v65_v11  ;;  %834 = vmatpush3.msra.mxu1 %v67_v8 }
  0x1e   :  { %715 = vmatmul.mubr.msk.f32.gmra.mxu0 %vm78_vm2, %v44_v10  ;;  %756 = vmatprep.subr.mxu0 %v926_v0 }
  0x1f   :  { %717 = vmatprep.mubr.msk.f32.mxu0 %vm927_vm0, %v926_v0  ;;  %757 = vmatpush3.msra.mxu0 %v64_v12 }
  0x20   :  { %758 = vmatprep.subr.mxu0 %v926_v0  ;;  %819 = vmatprep.subr.mxu1 %v926_v0 }
  0x21   :  { %759 = vmatpush3.msra.mxu0 %v63_v14  ;;  %835 = vmatpush3.msra.mxu1 %v66_v9 }
  0x22   :  { %718 = vmatmul.mubr.msk.f32.gmra.mxu0 %vm78_vm2, %v45_v13  ;;  %760 = vmatprep.subr.mxu0 %v926_v0 }
  0x23   :  { %720 = vmatprep.mubr.msk.f32.mxu0 %vm927_vm0, %v926_v0  ;;  %761 = vmatpush3.msra.mxu0 %v62_v15 }
  0x24   :  { %762 = vmatprep.subr.mxu0 %v926_v0  ;;  %820 = vmatprep.subr.mxu1 %v926_v0 }
  0x25   :  { %763 = vmatpush3.msra.mxu0 %v61_v17  ;;  %836 = vmatpush3.msra.mxu1 %v65_v11 }
  0x26   :  { %721 = vmatmul.mubr.msk.f32.gmra.mxu0 %vm78_vm2, %v46_v16  ;;  %764 = vmatprep.subr.mxu0 %v926_v0 }
  0x27   :  { %723 = vmatprep.mubr.msk.f32.mxu0 %vm927_vm0, %v926_v0  ;;  %765 = vmatpush3.msra.mxu0 %v60_v18 }
  0x28   :  { %766 = vmatprep.subr.mxu0 %v926_v0  ;;  %821 = vmatprep.subr.mxu1 %v926_v0 }
  0x29   :  { %767 = vmatpush3.msra.mxu0 %v59_v20  ;;  %837 = vmatpush3.msra.mxu1 %v64_v12 }
  0x2a   :  { %724 = vmatmul.mubr.msk.f32.gmra.mxu0 %vm78_vm2, %v47_v19  ;;  %768 = vmatprep.subr.mxu0 %v926_v0 }
  0x2b   :  { %726 = vmatprep.mubr.msk.f32.mxu0 %vm927_vm0, %v926_v0  ;;  %769 = vmatpush3.msra.mxu0 %v58_v21 }
  0x2c   :  { %822 = vmatprep.subr.mxu1 %v926_v0  ;;  %770 = vmatprep.subr.mxu0 %v926_v0 }
  0x2d   :  { %838 = vmatpush3.msra.mxu1 %v63_v14  ;;  %771 = vmatpush3.msra.mxu0 %v57_v28 }
  0x2e   :  { %727 = vmatmul.mubr.msk.f32.gmra.mxu0 %vm78_vm2, %v48_v22  ;;  %823 = vmatprep.subr.mxu1 %v926_v0 }
  0x2f   :  { %729 = vmatprep.mubr.msk.f32.mxu0 %vm927_vm0, %v926_v0  ;;  %839 = vmatpush3.msra.mxu1 %v62_v15 }
  0x30   :  { %824 = vmatprep.subr.mxu1 %v926_v0  ;;  %772 = vmatprep.subr.mxu0 %v926_v0 }
  0x31   :  { %840 = vmatpush3.msra.mxu1 %v61_v17  ;;  %773 = vmatpush3.msra.mxu0 %v56_v29 }
  0x32   :  { %730 = vmatmul.mubr.msk.f32.gmra.mxu0 %vm78_vm2, %v49_v23  ;;  %825 = vmatprep.subr.mxu1 %v926_v0 }
  0x33   :  { %732 = vmatprep.mubr.msk.f32.mxu0 %vm927_vm0, %v926_v0  ;;  %841 = vmatpush3.msra.mxu1 %v60_v18 }
  0x34   :  { %826 = vmatprep.subr.mxu1 %v926_v0  ;;  %774 = vmatprep.subr.mxu0 %v926_v0 }
  0x35   :  { %842 = vmatpush3.msra.mxu1 %v59_v20  ;;  %775 = vmatpush3.msra.mxu0 %v55_v30 }
  0x36   :  { %733 = vmatmul.mubr.msk.f32.gmra.mxu0 %vm78_vm2, %v50_v24  ;;  %827 = vmatprep.subr.mxu1 %v926_v0 }
  0x37   :  { %735 = vmatprep.mubr.msk.f32.mxu0 %vm927_vm0, %v926_v0  ;;  %843 = vmatpush3.msra.mxu1 %v58_v21  ;;  %v1201_v21 = vld [vmem:[%s1401_s4] ss:$0 sm:$0xff] }
  0x38   :  { %828 = vmatprep.subr.mxu1 %v926_v0 }
  0x39   :  { %844 = vmatpush3.msra.mxu1 %v57_v28 }
  0x3a   :  { %736 = vmatmul.mubr.msk.f32.gmra.mxu0 %vm78_vm2, %v51_v25  ;;  %829 = vmatprep.subr.mxu1 %v926_v0 }
  0x3b   :  { %738 = vmatprep.mubr.msk.f32.mxu0 %vm927_vm0, %v926_v0  ;;  %845 = vmatpush3.msra.mxu1 %v56_v29 }
  0x3c   :  { %830 = vmatprep.subr.mxu1 %v926_v0 }
  0x3d   :  { %846 = vmatpush3.msra.mxu1 %v55_v30 }
  0x3e   :  { %739 = vmatmul.mubr.msk.f32.gmra.mxu0 %vm78_vm2, %v52_v26 }
  0x3f   :  { %741 = vmatprep.mubr.msk.f32.mxu0 %vm927_vm0, %v926_v0 }
  0x42   :  { %742 = vmatmul.mubr.msk.f32.gmra.mxu0 %vm78_vm2, %v53_v27 }
  0x43   :  { %776 = vmatprep.mubr.msk.f32.mxu0 %vm927_vm0, %v926_v0 }
  0xd2   :  { %v188_v32 = vpop.f32.mrf.mxu0 }
  0xd3   :  { %v1099_v33 = vadd.f32 %v1096_v31, %v188_v32 }
  0xd4   :  { %v707_v34 = vpop.f32.mrf.mxu0 }
  0xd5   :  { %v252_v35 = vmax.f32 %v1099_v33, 0.0 }
  0xd6   :  { %v193_v36 = vpop.f32.mrf.mxu0 }
  0xd7   :  { %v1103_v37 = vadd.f32 %v1096_v31, %v193_v36  ;;  %777 = vmatmul.mubr.f32.vlgmr.msra.gmra.mxu0 %v252_v35 }
  0xd8   :  { %v710_v38 = vpop.f32.mrf.mxu0  ;;  %779 = vmatprep.mubr.msk.f32.mxu0 %vm927_vm0, %v926_v0 }
  0xd9   :  { %v253_v39 = vmax.f32 %v1103_v37, 0.0 }
  0xda   :  { %v198_v40 = vpop.f32.mrf.mxu0 }
  0xdb   :  { %v1111_v41 = vadd.f32 %v1096_v31, %v198_v40  ;;  %780 = vmatmul.mubr.f32.gmra.mxu0 %v253_v39 }
  0xdc   :  { %v713_v42 = vpop.f32.mrf.mxu0  ;;  %782 = vmatprep.mubr.msk.f32.mxu0 %vm927_vm0, %v926_v0 }
  0xdd   :  { %v254_v43 = vmax.f32 %v1111_v41, 0.0 }
  0xde   :  { %v203_v44 = vpop.f32.mrf.mxu0 }
  0xdf   :  { %v1119_v45 = vadd.f32 %v1096_v31, %v203_v44  ;;  %783 = vmatmul.mubr.f32.gmra.mxu0 %v254_v43 }
  0xe0   :  { %v716_v46 = vpop.f32.mrf.mxu0 }
  0xe1   :  { %v255_v47 = vmax.f32 %v1119_v45, 0.0 }
  0xe2   :  { %v208_v48 = vpop.f32.mrf.mxu0 }
  0xe3   :  { %v1125_v49 = vadd.f32 %v1096_v31, %v208_v48  ;;  %786 = vmatmul.mubr.f32.vlgmr.msra.gmra.mxu1 %v255_v47 }
  0xe4   :  { %v719_v50 = vpop.f32.mrf.mxu0  ;;  %788 = vmatprep.mubr.msk.f32.mxu1 %vm927_vm0, %v926_v0 }
  0xe5   :  { %v256_v51 = vmax.f32 %v1125_v49, 0.0 }
  0xe6   :  { %v213_v52 = vpop.f32.mrf.mxu0 }
  0xe7   :  { %v1133_v53 = vadd.f32 %v1096_v31, %v213_v52  ;;  %789 = vmatmul.mubr.f32.gmra.mxu1 %v256_v51 }
  0xe8   :  { %v722_v54 = vpop.f32.mrf.mxu0  ;;  %791 = vmatprep.mubr.msk.f32.mxu1 %vm927_vm0, %v926_v0 }
  0xe9   :  { %v257_v55 = vmax.f32 %v1133_v53, 0.0 }
  0xea   :  { %v218_v56 = vpop.f32.mrf.mxu0 }
  0xeb   :  { %v1141_v57 = vadd.f32 %v1096_v31, %v218_v56  ;;  %792 = vmatmul.mubr.f32.gmra.mxu1 %v257_v55 }
  0xec   :  { %v725_v58 = vpop.f32.mrf.mxu0  ;;  %794 = vmatprep.mubr.msk.f32.mxu1 %vm927_vm0, %v926_v0 }
  0xed   :  { %v258_v59 = vmax.f32 %v1141_v57, 0.0 }
  0xee   :  { %v223_v60 = vpop.f32.mrf.mxu0 }
  0xef   :  { %v1149_v61 = vadd.f32 %v1096_v31, %v223_v60  ;;  %795 = vmatmul.mubr.f32.gmra.mxu1 %v258_v59 }
  0xf0   :  { %v728_v62 = vpop.f32.mrf.mxu0  ;;  %797 = vmatprep.mubr.msk.f32.mxu1 %vm927_vm0, %v926_v0 }
  0xf1   :  { %v259_v63 = vmax.f32 %v1149_v61, 0.0 }
  0xf2   :  { %v228_v1 = vpop.f32.mrf.mxu0 }
  0xf3   :  { %v1157_v2 = vadd.f32 %v1096_v31, %v228_v1  ;;  %798 = vmatmul.mubr.f32.gmra.mxu1 %v259_v63 }
  0xf4   :  { %v731_v3 = vpop.f32.mrf.mxu0  ;;  %800 = vmatprep.mubr.msk.f32.mxu1 %vm927_vm0, %v926_v0 }
  0xf5   :  { %v260_v4 = vmax.f32 %v1157_v2, 0.0 }
  0xf6   :  { %v233_v5 = vpop.f32.mrf.mxu0 }
  0xf7   :  { %v1165_v6 = vadd.f32 %v1096_v31, %v233_v5  ;;  %801 = vmatmul.mubr.f32.gmra.mxu1 %v260_v4 }
  0xf8   :  { %v734_v7 = vpop.f32.mrf.mxu0  ;;  %803 = vmatprep.mubr.msk.f32.mxu1 %vm927_vm0, %v926_v0 }
  0xf9   :  { %v261_v8 = vmax.f32 %v1165_v6, 0.0 }
  0xfa   :  { %v238_v9 = vpop.f32.mrf.mxu0 }
  0xfb   :  { %v1173_v10 = vadd.f32 %v1096_v31, %v238_v9  ;;  %804 = vmatmul.mubr.f32.gmra.mxu1 %v261_v8 }
  0xfc   :  { %v737_v11 = vpop.f32.mrf.mxu0  ;;  %806 = vmatprep.mubr.msk.f32.mxu1 %vm927_vm0, %v926_v0 }
  0xfd   :  { %v262_v12 = vmax.f32 %v1173_v10, 0.0 }
  0xfe   :  { %v243_v13 = vpop.f32.mrf.mxu0 }
  0xff   :  { %v1181_v14 = vadd.f32 %v1096_v31, %v243_v13  ;;  %807 = vmatmul.mubr.f32.gmra.mxu1 %v262_v12 }
 0x100   :  { %v740_v15 = vpop.f32.mrf.mxu0  ;;  %809 = vmatprep.mubr.msk.f32.mxu1 %vm927_vm0, %v926_v0 }
 0x101   :  { %v263_v16 = vmax.f32 %v1181_v14, 0.0 }
 0x102   :  { %v248_v17 = vpop.f32.mrf.mxu0 }
 0x103   :  { %v1189_v18 = vadd.f32 %v1096_v31, %v248_v17  ;;  %810 = vmatmul.mubr.f32.gmra.mxu1 %v263_v16 }
 0x104   :  { %v743_v19 = vpop.f32.mrf.mxu0  ;;  %812 = vmatprep.mubr.msk.f32.mxu1 %vm927_vm0, %v926_v0 }
 0x105   :  { %v264_v20 = vmax.f32 %v1189_v18, 0.0 }
 0x107   :  { %813 = vmatmul.mubr.f32.gmra.mxu1 %v264_v20 }
 0x197   :  { %v338_v22 = vpop.f32.mrf.mxu0 }
 0x198   :  { %v339_v23 = vadd.f32 %v1201_v21, %v338_v22 }
 0x199   :  { %v778_v24 = vpop.f32.mrf.mxu0 }
 0x19a   :  { %v402_v25 = vmax.f32 %v339_v23, 0.0 }
 0x19b   :  { %v343_v26 = vpop.f32.mrf.mxu0 }
 0x19c   :  { %v344_v27 = vadd.f32 %v1201_v21, %v343_v26  ;;  %v1207_v0 = vadd.f32 %v402_v25, %v252_v35 }
 0x19d   :  { %v781_v28 = vpop.f32.mrf.mxu0 }
 0x19e   :  { %v403_v29 = vmax.f32 %v344_v27, 0.0  ;;  %428 = vadd.xlane.f32.xlu0 %v1207_v0 }
 0x19f   :  { %v348_v30 = vpop.f32.mrf.mxu0 }
 0x1a0   :  { %v349_v31 = vadd.f32 %v1201_v21, %v348_v30  ;;  %v1213_v32 = vadd.f32 %v403_v29, %v253_v39 }
 0x1a1   :  { %v784_v34 = vpop.f32.mrf.mxu0 }
 0x1a2   :  { %v404_v36 = vmax.f32 %v349_v31, 0.0  ;;  %430 = vadd.xlane.f32.xlu0 %v1213_v32 }
 0x1a3   :  { %v353_v38 = vpop.f32.mrf.mxu1 }
 0x1a4   :  { %v354_v33 = vadd.f32 %v1201_v21, %v353_v38  ;;  %v1219_v35 = vadd.f32 %v404_v36, %v254_v43 }
 0x1a5   :  { %v787_v40 = vpop.f32.mrf.mxu1 }
 0x1a6   :  { %v405_v42 = vmax.f32 %v354_v33, 0.0  ;;  %432 = vadd.xlane.f32.xlu1 %v1219_v35 }
 0x1a7   :  { %v358_v44 = vpop.f32.mrf.mxu1 }
 0x1a8   :  { %v359_v37 = vadd.f32 %v1201_v21, %v358_v44  ;;  %v1225_v39 = vadd.f32 %v405_v42, %v255_v47 }
 0x1a9   :  { %v790_v46 = vpop.f32.mrf.mxu1 }
 0x1aa   :  { %v406_v48 = vmax.f32 %v359_v37, 0.0  ;;  %434 = vadd.xlane.f32.xlu1 %v1225_v39 }
 0x1ab   :  { %v363_v50 = vpop.f32.mrf.mxu1 }
 0x1ac   :  { %v364_v41 = vadd.f32 %v1201_v21, %v363_v50  ;;  %v1231_v43 = vadd.f32 %v406_v48, %v256_v51 }
 0x1ad   :  { %v793_v52 = vpop.f32.mrf.mxu1 }
 0x1ae   :  { %v407_v54 = vmax.f32 %v364_v41, 0.0  ;;  %436 = vadd.xlane.f32.xlu0 %v1231_v43 }
 0x1af   :  { %v368_v56 = vpop.f32.mrf.mxu1 }
 0x1b0   :  { %v369_v45 = vadd.f32 %v1201_v21, %v368_v56  ;;  %v1237_v47 = vadd.f32 %v407_v54, %v257_v55 }
 0x1b1   :  { %v796_v58 = vpop.f32.mrf.mxu1 }
 0x1b2   :  { %v408_v60 = vmax.f32 %v369_v45, 0.0  ;;  %438 = vadd.xlane.f32.xlu1 %v1237_v47 }
 0x1b3   :  { %v373_v62 = vpop.f32.mrf.mxu1 }
 0x1b4   :  { %v374_v49 = vadd.f32 %v1201_v21, %v373_v62  ;;  %v1243_v51 = vadd.f32 %v408_v60, %v258_v59 }
 0x1b5   :  { %v799_v1 = vpop.f32.mrf.mxu1 }
 0x1b6   :  { %v409_v3 = vmax.f32 %v374_v49, 0.0  ;;  %440 = vadd.xlane.f32.xlu0 %v1243_v51 }
 0x1b7   :  { %v378_v5 = vpop.f32.mrf.mxu1 }
 0x1b8   :  { %v379_v53 = vadd.f32 %v1201_v21, %v378_v5  ;;  %v1249_v55 = vadd.f32 %v409_v3, %v259_v63 }
 0x1b9   :  { %v802_v7 = vpop.f32.mrf.mxu1 }
 0x1ba   :  { %v410_v9 = vmax.f32 %v379_v53, 0.0  ;;  %442 = vadd.xlane.f32.xlu1 %v1249_v55 }
 0x1bb   :  { %v383_v11 = vpop.f32.mrf.mxu1 }
 0x1bc   :  { %v384_v57 = vadd.f32 %v1201_v21, %v383_v11  ;;  %v1255_v59 = vadd.f32 %v410_v9, %v260_v4 }
 0x1bd   :  { %v805_v13 = vpop.f32.mrf.mxu1 }
 0x1be   :  { %v411_v15 = vmax.f32 %v384_v57, 0.0  ;;  %444 = vadd.xlane.f32.xlu0 %v1255_v59 }
 0x1bf   :  { %v388_v17 = vpop.f32.mrf.mxu1 }
 0x1c0   :  { %v389_v61 = vadd.f32 %v1201_v21, %v388_v17  ;;  %v1261_v63 = vadd.f32 %v411_v15, %v261_v8 }
 0x1c1   :  { %v808_v19 = vpop.f32.mrf.mxu1 }
 0x1c2   :  { %v412_v22 = vmax.f32 %v389_v61, 0.0  ;;  %446 = vadd.xlane.f32.xlu1 %v1261_v63 }
 0x1c3   :  { %v393_v23 = vpop.f32.mrf.mxu1 }
 0x1c4   :  { %v394_v2 = vadd.f32 %v1201_v21, %v393_v23  ;;  %v1267_v4 = vadd.f32 %v412_v22, %v262_v12 }
 0x1c5   :  { %v811_v24 = vpop.f32.mrf.mxu1 }
 0x1c6   :  { %v413_v25 = vmax.f32 %v394_v2, 0.0  ;;  %448 = vadd.xlane.f32.xlu0 %v1267_v4 }
 0x1c7   :  { %v398_v26 = vpop.f32.mrf.mxu1 }
 0x1c8   :  { %v399_v6 = vadd.f32 %v1201_v21, %v398_v26  ;;  %v426_v8 = vadd.f32 %v413_v25, %v263_v16 }
 0x1c9   :  { %v814_v27 = vpop.f32.mrf.mxu1 }
 0x1ca   :  { %v414_v28 = vmax.f32 %v399_v6, 0.0  ;;  %450 = vadd.xlane.f32.xlu1 %v426_v8 }
 0x1cc   :  { %v1275_v29 = vadd.f32 %v414_v28, %v264_v20 }
 0x1ce   :  { %452 = vadd.xlane.f32.xlu0 %v1275_v29 }
 0x227   :  { %v429_v10 = vpop.xlane.xlu0 %428 }
 0x228   :  { %v455_v12 = vmul.f32 0.0078125, %v429_v10 }
 0x22a   :  { %v1279_v30 = vsub.f32 %v1207_v0, %v455_v12 }
 0x22b   :  { %v431_v31 = vpop.xlane.xlu0 %430 }
 0x22c   :  { %v456_v34 = vmul.f32 0.0078125, %v431_v31  ;;  %v481_v14 = vmul.f32 %v1279_v30, %v1279_v30 }
 0x22e   :  { %v1284_v16 = vsub.f32 %v1213_v32, %v456_v34  ;;  %494 = vadd.xlane.f32.xlu1 %v481_v14  ;;  %v1345_v34 = vld [vmem:[%s1402_s5] ss:$0 sm:$0xff]  ;;  %s928_s5 = smov [#allocation5]  }
 0x22f   :  { %v433_v21 = vpop.xlane.xlu1 %432 }
 0x230   :  { %v457_v18 = vmul.f32 0.0078125, %v433_v21  ;;  %v482_v20 = vmul.f32 %v1284_v16, %v1284_v16 }
 0x232   :  { %v1289_v36 = vsub.f32 %v1219_v35, %v457_v18  ;;  %496 = vadd.xlane.f32.xlu0 %v482_v20  ;;  %v1351_v18 = vld [vmem:[%s1403_s6] ss:$0 sm:$0xff]  ;;  %s630_s6 = sshll.u32 %s928_s5, 4  ;;  %s631_s6 = int_to_ptr.vmem [resolvable:$true] %s630_s6 }
 0x233   :  { %v435_v0 = vpop.xlane.xlu1 %434  ;;  %s899_s16 = scalar_lea.vmem %s631_s6, 1664  ;;  %p904_p6 = scmp.lt.s32.totalorder %s631_s6, %s631_s6 }
 0x234   :  { %v458_v38 = vmul.f32 0.0078125, %v435_v0  ;;  %v483_v33 = vmul.f32 %v1289_v36, %v1289_v36  ;;  %p900_p5 = scmp.ne.s32.totalorder %s631_s6, %s899_s16  ;;  %p905_p7 = scmp.lt.s32.totalorder %s899_s16, %s899_s16 }
 0x236   :  { %v1294_v40 = vsub.f32 %v1225_v39, %v458_v38  ;;  %498 = vadd.xlane.f32.xlu1 %v483_v33  ;;  %p906_p8 = por %p905_p7, %p904_p6 }
 0x237   :  { %v437_v32 = vpop.xlane.xlu0 %436 }
 0x238   :  { %v459_v42 = vmul.f32 0.0078125, %v437_v32  ;;  %v484_v44 = vmul.f32 %v1294_v40, %v1294_v40  ;;  %p907_p9 = pnand %p906_p8, %p900_p5 }
 0x23a   :  { %v1299_v37 = vsub.f32 %v1231_v43, %v459_v42  ;;  %500 = vadd.xlane.f32.xlu0 %v484_v44 }
 0x23b   :  { %v439_v35 = vpop.xlane.xlu1 %438 }
 0x23c   :  { %v460_v46 = vmul.f32 0.0078125, %v439_v35  ;;  %v485_v48 = vmul.f32 %v1299_v37, %v1299_v37 }
 0x23e   :  { %v1304_v50 = vsub.f32 %v1237_v47, %v460_v46  ;;  %502 = vadd.xlane.f32.xlu1 %v485_v48 }
 0x23f   :  { %v441_v39 = vpop.xlane.xlu0 %440 }
 0x240   :  { %v461_v41 = vmul.f32 0.0078125, %v441_v39  ;;  %v486_v52 = vmul.f32 %v1304_v50, %v1304_v50 }
 0x242   :  { %v1309_v54 = vsub.f32 %v1243_v51, %v461_v41  ;;  %504 = vadd.xlane.f32.xlu0 %v486_v52 }
 0x243   :  { %v443_v43 = vpop.xlane.xlu1 %442 }
 0x244   :  { %v462_v56 = vmul.f32 0.0078125, %v443_v43  ;;  %v487_v45 = vmul.f32 %v1309_v54, %v1309_v54 }
 0x246   :  { %v1314_v58 = vsub.f32 %v1249_v55, %v462_v56  ;;  %506 = vadd.xlane.f32.xlu1 %v487_v45 }
 0x247   :  { %v445_v47 = vpop.xlane.xlu0 %444 }
 0x248   :  { %v463_v60 = vmul.f32 0.0078125, %v445_v47  ;;  %v488_v62 = vmul.f32 %v1314_v58, %v1314_v58 }
 0x24a   :  { %v1319_v49 = vsub.f32 %v1255_v59, %v463_v60  ;;  %508 = vadd.xlane.f32.xlu0 %v488_v62 }
 0x24b   :  { %v447_v51 = vpop.xlane.xlu1 %446 }
 0x24c   :  { %v464_v1 = vmul.f32 0.0078125, %v447_v51  ;;  %v489_v3 = vmul.f32 %v1319_v49, %v1319_v49 }
 0x24e   :  { %v1324_v5 = vsub.f32 %v1261_v63, %v464_v1  ;;  %510 = vadd.xlane.f32.xlu1 %v489_v3 }
 0x24f   :  { %v449_v53 = vpop.xlane.xlu0 %448 }
 0x250   :  { %v465_v55 = vmul.f32 0.0078125, %v449_v53  ;;  %v490_v7 = vmul.f32 %v1324_v5, %v1324_v5 }
 0x252   :  { %v1329_v9 = vsub.f32 %v1267_v4, %v465_v55  ;;  %512 = vadd.xlane.f32.xlu0 %v490_v7 }
 0x253   :  { %v451_v11 = vpop.xlane.xlu1 %450 }
 0x254   :  { %v466_v57 = vmul.f32 0.0078125, %v451_v11  ;;  %v491_v59 = vmul.f32 %v1329_v9, %v1329_v9 }
 0x256   :  { %v1333_v13 = vsub.f32 %v426_v8, %v466_v57  ;;  %514 = vadd.xlane.f32.xlu1 %v491_v59 }
 0x257   :  { %v453_v15 = vpop.xlane.xlu0 %452 }
 0x258   :  { %v467_v17 = vmul.f32 0.0078125, %v453_v15  ;;  %v492_v61 = vmul.f32 %v1333_v13, %v1333_v13 }
 0x25a   :  { %v1338_v63 = vsub.f32 %v1275_v29, %v467_v17  ;;  %516 = vadd.xlane.f32.xlu0 %v492_v61 }
 0x25c   :  { %v493_v19 = vmul.f32 %v1338_v63, %v1338_v63 }
 0x25e   :  { %518 = vadd.xlane.f32.xlu1 %v493_v19 }
 0x2b7   :  { %v495_v22 = vpop.xlane.xlu1 %494 }
 0x2b8   :  { %v520_v23 = vmul.f32 0.0078125, %v495_v22 }
 0x2ba   :  { %v533_v2 = vadd.f32 1e-05, %v520_v23 }
 0x2bb   :  { %v497_v4 = vpop.xlane.xlu0 %496 }
 0x2bc   :  { %853 = vrsqrt.f32 %v533_v2  ;;  %v521_v24 = vmul.f32 0.0078125, %v497_v4 }
 0x2be   :  { %v534_v25 = vadd.f32 1e-05, %v521_v24 }
 0x2bf   :  { %v499_v26 = vpop.xlane.xlu1 %498 }
 0x2c0   :  { %855 = vrsqrt.f32 %v534_v25  ;;  %v522_v6 = vmul.f32 0.0078125, %v499_v26 }
 0x2c2   :  { %v535_v8 = vadd.f32 1e-05, %v522_v6 }
 0x2c3   :  { %v501_v27 = vpop.xlane.xlu0 %500 }
 0x2c4   :  { %857 = vrsqrt.f32 %v535_v8  ;;  %v523_v28 = vmul.f32 0.0078125, %v501_v27 }
 0x2c6   :  { %v536_v29 = vadd.f32 1e-05, %v523_v28 }
 0x2c7   :  { %v503_v10 = vpop.xlane.xlu1 %502 }
 0x2c8   :  { %859 = vrsqrt.f32 %v536_v29  ;;  %v524_v12 = vmul.f32 0.0078125, %v503_v10 }
 0x2c9   :  { %v854_v31 = vpop.eup %853 }
 0x2ca   :  { %v559_v14 = vmul.f32 %v854_v31, %v1279_v30  ;;  %v537_v21 = vadd.f32 1e-05, %v524_v12 }
 0x2cb   :  { %v505_v20 = vpop.xlane.xlu0 %504 }
 0x2cc   :  { %v579_v0 = vmul.f32 %v1345_v34, %v559_v14  ;;  %861 = vrsqrt.f32 %v537_v21  ;;  %v525_v38 = vmul.f32 0.0078125, %v505_v20 }
 0x2cd   :  { %v856_v33 = vpop.eup %855 }
 0x2ce   :  { %v599_v32 = vadd.f32 %v1351_v18, %v579_v0  ;;  %v560_v42 = vmul.f32 %v856_v33, %v1284_v16  ;;  %v538_v44 = vadd.f32 1e-05, %v525_v38 }
 0x2cf   :  { %v507_v35 = vpop.xlane.xlu1 %506 }
 0x2d0   :  { %612 = vst [vmem:[#allocation5] sm:$0xff] %v599_v32  ;;  %v580_v30 = vmul.f32 %v1345_v34, %v560_v42  ;;  %863 = vrsqrt.f32 %v538_v44  ;;  %v526_v46 = vmul.f32 0.0078125, %v507_v35 }
 0x2d1   :  { %v858_v48 = vpop.eup %857 }
 0x2d2   :  { %v600_v39 = vadd.f32 %v1351_v18, %v580_v30  ;;  %v561_v41 = vmul.f32 %v858_v48, %v1289_v36  ;;  %v539_v52 = vadd.f32 1e-05, %v526_v46 }
 0x2d3   :  { %v509_v43 = vpop.xlane.xlu0 %508 }
 0x2d4   :  { %613 = vst [vmem:[#allocation5 + $0x8] sm:$0xff] %v600_v39  ;;  %v581_v56 = vmul.f32 %v1345_v34, %v561_v41  ;;  %865 = vrsqrt.f32 %v539_v52  ;;  %v527_v45 = vmul.f32 0.0078125, %v509_v43 }
 0x2d5   :  { %v860_v16 = vpop.eup %859 }
 0x2d6   :  { %v601_v47 = vadd.f32 %v1351_v18, %v581_v56  ;;  %v562_v60 = vmul.f32 %v860_v16, %v1294_v40  ;;  %v540_v62 = vadd.f32 1e-05, %v527_v45 }
 0x2d7   :  { %v511_v51 = vpop.xlane.xlu1 %510 }
 0x2d8   :  { %614 = vst [vmem:[#allocation5 + $0x10] sm:$0xff] %v601_v47  ;;  %v582_v1 = vmul.f32 %v1345_v34, %v562_v60  ;;  %867 = vrsqrt.f32 %v540_v62  ;;  %v528_v3 = vmul.f32 0.0078125, %v511_v51 }
 0x2d9   :  { %v862_v36 = vpop.eup %861 }
 0x2da   :  { %v602_v53 = vadd.f32 %v1351_v18, %v582_v1  ;;  %v563_v55 = vmul.f32 %v862_v36, %v1299_v37  ;;  %v541_v7 = vadd.f32 1e-05, %v528_v3 }
 0x2db   :  { %v513_v11 = vpop.xlane.xlu0 %512 }
 0x2dc   :  { %615 = vst [vmem:[#allocation5 + $0x18] sm:$0xff] %v602_v53  ;;  %v583_v57 = vmul.f32 %v1345_v34, %v563_v55  ;;  %869 = vrsqrt.f32 %v541_v7  ;;  %v529_v59 = vmul.f32 0.0078125, %v513_v11 }
 0x2dd   :  { %v864_v40 = vpop.eup %863 }
 0x2de   :  { %v603_v15 = vadd.f32 %v1351_v18, %v583_v57  ;;  %v564_v17 = vmul.f32 %v864_v40, %v1304_v50  ;;  %v542_v61 = vadd.f32 1e-05, %v529_v59 }
 0x2df   :  { %v515_v19 = vpop.xlane.xlu1 %514 }
 0x2e0   :  { %616 = vst [vmem:[#allocation5 + $0x20] sm:$0xff] %v603_v15  ;;  %v584_v22 = vmul.f32 %v1345_v34, %v564_v17  ;;  %871 = vrsqrt.f32 %v542_v61  ;;  %v530_v23 = vmul.f32 0.0078125, %v515_v19 }
 0x2e1   :  { %v866_v37 = vpop.eup %865 }
 0x2e2   :  { %v604_v2 = vadd.f32 %v1351_v18, %v584_v22  ;;  %v565_v4 = vmul.f32 %v866_v37, %v1309_v54  ;;  %v543_v24 = vadd.f32 1e-05, %v530_v23 }
 0x2e3   :  { %v517_v25 = vpop.xlane.xlu0 %516 }
 0x2e4   :  { %617 = vst [vmem:[#allocation5 + $0x28] sm:$0xff] %v604_v2  ;;  %v585_v26 = vmul.f32 %v1345_v34, %v565_v4  ;;  %873 = vrsqrt.f32 %v543_v24  ;;  %v531_v6 = vmul.f32 0.0078125, %v517_v25 }
 0x2e5   :  { %v868_v50 = vpop.eup %867 }
 0x2e6   :  { %v605_v8 = vadd.f32 %v1351_v18, %v585_v26  ;;  %v566_v27 = vmul.f32 %v868_v50, %v1314_v58  ;;  %v544_v28 = vadd.f32 1e-05, %v531_v6 }
 0x2e7   :  { %v519_v29 = vpop.xlane.xlu1 %518 }
 0x2e8   :  { %618 = vst [vmem:[#allocation5 + $0x30] sm:$0xff] %v605_v8  ;;  %v586_v10 = vmul.f32 %v1345_v34, %v566_v27  ;;  %875 = vrsqrt.f32 %v544_v28  ;;  %v532_v12 = vmul.f32 0.0078125, %v519_v29 }
 0x2e9   :  { %v870_v54 = vpop.eup %869 }
 0x2ea   :  { %v606_v31 = vadd.f32 %v1351_v18, %v586_v10  ;;  %v567_v14 = vmul.f32 %v870_v54, %v1319_v49  ;;  %v545_v21 = vadd.f32 1e-05, %v532_v12 }
 0x2ec   :  { %619 = vst [vmem:[#allocation5 + $0x38] sm:$0xff] %v606_v31  ;;  %v587_v20 = vmul.f32 %v1345_v34, %v567_v14  ;;  %877 = vrsqrt.f32 %v545_v21 }
 0x2ed   :  { %v872_v0 = vpop.eup %871 }
 0x2ee   :  { %v607_v58 = vadd.f32 %v1351_v18, %v587_v20  ;;  %v568_v38 = vmul.f32 %v872_v0, %v1324_v5 }
 0x2f0   :  { %620 = vst [vmem:[#allocation5 + $0x40] sm:$0xff] %v607_v58  ;;  %v588_v33 = vmul.f32 %v1345_v34, %v568_v38 }
 0x2f1   :  { %v874_v32 = vpop.eup %873 }
 0x2f2   :  { %v608_v42 = vadd.f32 %v1351_v18, %v588_v33  ;;  %v569_v44 = vmul.f32 %v874_v32, %v1329_v9 }
 0x2f4   :  { %621 = vst [vmem:[#allocation5 + $0x48] sm:$0xff] %v608_v42  ;;  %v589_v49 = vmul.f32 %v1345_v34, %v569_v44 }
 0x2f5   :  { %v876_v35 = vpop.eup %875 }
 0x2f6   :  { %v609_v30 = vadd.f32 %v1351_v18, %v589_v49  ;;  %v570_v46 = vmul.f32 %v876_v35, %v1333_v13 }
 0x2f8   :  { %622 = vst [vmem:[#allocation5 + $0x50] sm:$0xff] %v609_v30  ;;  %v590_v48 = vmul.f32 %v1345_v34, %v570_v46 }
 0x2f9   :  { %v878_v5 = vpop.eup %877 }
 0x2fa   :  { %v610_v39 = vadd.f32 %v1351_v18, %v590_v48  ;;  %v571_v41 = vmul.f32 %v878_v5, %v1338_v63 }
 0x2fc   :  { %623 = vst [vmem:[#allocation5 + $0x58] sm:$0xff] %v610_v39  ;;  %v591_v9 = vmul.f32 %v1345_v34, %v571_v41 }
 0x2fe   :  { %v611_v52 = vadd.f32 %v1351_v18, %v591_v9 }
 0x300   :  { %624 = vst [vmem:[#allocation5 + $0x60] sm:$0xff] %v611_v52 }
 0x301   :  { %910 = shalt.err (!%p907_p9)
}
 0x302   :  { %636 = dma.vmem_to_hbm [thread:$0]  %s631_s6, 1664, %s1404_s7, [#allocation4], %s924_s27, %s924_s27, %s925_s28  }
 0x303   :  { %921 = dma.done.wait [#allocation4], 1664  }
 0x304   :  { %922 = vsyncadd [#allocation4], 4294965632 }
 0x305   :  { %640 = vsyncpa [#allocation3], 1 }
 0x306   :  { %641 = vsyncpa [#allocation4], 1 }

</bundles_post_ra>
